<compile_context>
chip_gen: v7x
topology: tpu7x:2x2x1
jax: 0.10.0
libtpu: 0.0.40
codegen_flags: <defaults>
</compile_context>

<pallas_src>
import functools

import jax
import jax.numpy as jnp
from jax.experimental import pallas as pl
from jax.experimental.pallas import tpu as pltpu


def _round_up(x, m):
    return ((x + m - 1) // m) * m


def _pad_axis(x, target, axis):
    pad = target - x.shape[axis]
    if pad <= 0:
        return x
    widths = [(0, 0)] * x.ndim
    widths[axis] = (0, pad)
    return jnp.pad(x, widths)


# ----------------------------------------------------------------------------
# Fused GEMM + bias (+ residual) (+ ReLU) Pallas kernels.
#   A: (Mp, Kp) bf16   B: (Kp, Np) bf16   bias: (1, Np) f32   res: (Mp, Np)
#   out = relu?(A @ B + bias [+ res])  cast to out dtype.
# Full-K blocks; grid over (M tiles, N tiles); both axes parallel.
# ----------------------------------------------------------------------------
def _fused_gemm_kernel(a_ref, b_ref, bias_ref, o_ref, *, relu):
    y = jnp.dot(a_ref[...], b_ref[...], preferred_element_type=jnp.float32)
    y = y + bias_ref[...]
    if relu:
        y = jnp.maximum(y, 0.0)
    o_ref[...] = y.astype(o_ref.dtype)


def _fused_gemm_res_kernel(a_ref, b_ref, bias_ref, r_ref, o_ref, *, relu):
    y = jnp.dot(a_ref[...], b_ref[...], preferred_element_type=jnp.float32)
    y = y + bias_ref[...] + r_ref[...].astype(jnp.float32)
    if relu:
        y = jnp.maximum(y, 0.0)
    o_ref[...] = y.astype(o_ref.dtype)


def _choose_tm(mp):
    # mp is a multiple of 8.
    if mp >= 256 and mp % 128 == 0:
        return 128
    if mp > 16 and mp % 16 == 0:
        return mp // 2            # >=2 parallel M blocks when reasonable
    return mp


def _choose_tn(np_):
    if np_ <= 128:
        return np_
    if np_ % 256 == 0 and np_ // 256 >= 2:
        return 256                # N=512 -> 2 blocks of 256
    if np_ % 128 == 0:
        return 128                # N=256 -> 2 blocks of 128
    return np_


def fused_gemm_bn(a_bf16, w_bf16, bias_f32, residual=None, relu=True,
                  out_dtype=jnp.bfloat16):
    mp, kp = a_bf16.shape
    kp2, np_ = w_bf16.shape
    assert kp == kp2
    tm = _choose_tm(mp)
    tn = _choose_tn(np_)
    grid = (mp // tm, np_ // tn)

    in_specs = [pl.BlockSpec((tm, kp), lambda i, j: (i, 0)),
                pl.BlockSpec((kp, tn), lambda i, j: (0, j)),
                pl.BlockSpec((1, tn), lambda i, j: (0, j))]
    args = [a_bf16, w_bf16, bias_f32]
    if residual is not None:
        in_specs.append(pl.BlockSpec((tm, tn), lambda i, j: (i, j)))
        args.append(residual)
        kern = functools.partial(_fused_gemm_res_kernel, relu=relu)
    else:
        kern = functools.partial(_fused_gemm_kernel, relu=relu)

    return pl.pallas_call(
        kern,
        out_shape=jax.ShapeDtypeStruct((mp, np_), out_dtype),
        grid=grid,
        in_specs=in_specs,
        out_specs=pl.BlockSpec((tm, tn), lambda i, j: (i, j)),
        compiler_params=pltpu.CompilerParams(
            dimension_semantics=("parallel", "parallel")),
    )(*args)


# ----------------------------------------------------------------------------
# Cosine classifier head: temperature * normalize(x) @ normalize(W).T
# ----------------------------------------------------------------------------
def _cos_head_kernel(temperature, x_ref, w_ref, o_ref):
    x = x_ref[...]
    w = w_ref[...]
    # F.normalize(p=2, dim=-1): v / max(||v||, 1e-12) == v * rsqrt(max(||v||^2, 1e-24))
    xn = x * jax.lax.rsqrt(jnp.maximum(jnp.sum(x * x, axis=-1, keepdims=True), 1e-24))
    wn = w * jax.lax.rsqrt(jnp.maximum(jnp.sum(w * w, axis=-1, keepdims=True), 1e-24))
    o_ref[...] = temperature * jax.lax.dot_general(
        xn, wn, (((1,), (1,)), ((), ())), preferred_element_type=jnp.float32)


def pallas_cos_head(x, w, temperature):
    n, d = x.shape
    c, d2 = w.shape
    assert d == d2
    x_p = _pad_axis(x.astype(jnp.float32), _round_up(n, 8), 0)
    w_p = _pad_axis(w.astype(jnp.float32), _round_up(c, 8), 0)
    np_, cp = x_p.shape[0], w_p.shape[0]
    out = pl.pallas_call(
        functools.partial(_cos_head_kernel, float(temperature)),
        out_shape=jax.ShapeDtypeStruct((np_, cp), jnp.float32),
        grid=(1,),
        in_specs=[pl.BlockSpec((np_, d), lambda i: (0, 0)),
                  pl.BlockSpec((cp, d), lambda i: (0, 0))],
        out_specs=pl.BlockSpec((np_, cp), lambda i: (0, 0)),
    )(x_p, w_p)
    return out[:n, :c]


def pallas_dot_fc(feats, fc_w):
    """'dot' mode: feats @ fc_w.T via the fused GEMM with a zero bias."""
    n, d = feats.shape
    c, d2 = fc_w.shape
    assert d == d2
    b = _pad_axis(jnp.transpose(fc_w).astype(jnp.bfloat16), _round_up(c, 128), 1)
    a = _pad_axis(feats.astype(jnp.bfloat16), _round_up(n, 8), 0)
    bias = jnp.zeros((1, b.shape[1]), jnp.float32)
    y = fused_gemm_bn(a, b, bias, relu=False, out_dtype=jnp.float32)
    return y[:n, :c]


# ----------------------------------------------------------------------------
# Plain-JAX glue: im2col patch extraction, maxpool.
# TODO(synk): im2col / maxpool window extraction kept in plain JAX (layout glue).
# ----------------------------------------------------------------------------
def _im2col(x_nhwc, kh, kw, stride, pad):
    n, h, w, c = x_nhwc.shape
    xp = jnp.pad(x_nhwc, ((0, 0), (pad, pad), (pad, pad), (0, 0)))
    oh = (h + 2 * pad - kh) // stride + 1
    ow = (w + 2 * pad - kw) // stride + 1
    cols = []
    for i in range(kh):
        for j in range(kw):
            cols.append(xp[:, i:i + stride * oh:stride,
                           j:j + stride * ow:stride, :])
    patches = jnp.concatenate(cols, axis=-1)           # (n,oh,ow, kh*kw*c), (kh,kw,c) order
    return patches.reshape(n * oh * ow, kh * kw * c), (n, oh, ow)


def maxpool_3x3_s2_p1(x_nhwc):
    n, h, w, c = x_nhwc.shape
    neg = jnp.asarray(-jnp.inf, x_nhwc.dtype)
    xp = jnp.pad(x_nhwc, ((0, 0), (1, 1), (1, 1), (0, 0)), constant_values=neg)
    oh = (h + 2 - 3) // 2 + 1
    ow = (w + 2 - 3) // 2 + 1
    vals = []
    for i in range(3):
        for j in range(3):
            vals.append(xp[:, i:i + 2 * oh:2, j:j + 2 * ow:2, :])
    return jnp.max(jnp.stack(vals, 0), axis=0)


# ----------------------------------------------------------------------------
# Fused conv + BN(+residual)(+ReLU) via the Pallas GEMM.
# ----------------------------------------------------------------------------
def conv_bn(x_nhwc, cw, stride, pad, relu=True, residual_2d=None):
    a, (n, oh, ow) = _im2col(x_nhwc.astype(jnp.bfloat16),
                             cw['kh'], cw['kw'], stride, pad)
    m = n * oh * ow
    a = _pad_axis(a, cw['kp'], 1)                 # zero-pad K to weight layout
    mp = _round_up(m, 8)
    a = _pad_axis(a, mp, 0)
    res = None
    if residual_2d is not None:
        res = _pad_axis(residual_2d, mp, 0)       # stays bf16, upcast in-kernel
    y = fused_gemm_bn(a, cw['w'], cw['bias'], residual=res, relu=relu)
    return y[:m], (n, oh, ow, cw['co'])


def basic_block(x_nhwc, blk):
    s = blk['stride']
    y1, shp1 = conv_bn(x_nhwc, blk['conv1'], s, 1, relu=True)
    y1 = y1.reshape(shp1)
    if 'ds' in blk:
        idn, _ = conv_bn(x_nhwc, blk['ds'], s, 0, relu=False)
    else:
        n, h, w, c = x_nhwc.shape
        idn = x_nhwc.reshape(n * h * w, c).astype(jnp.bfloat16)
    out, shp2 = conv_bn(y1, blk['conv2'], 1, 1, relu=True, residual_2d=idn)
    return out.reshape(shp2)


# ----------------------------------------------------------------------------
# Parameters: deterministic ResNet18 init (conv1 modified to 1 input channel),
# then one-time prep: fold BN scale into weights, transpose/pad/cast to bf16.
# ----------------------------------------------------------------------------
def init_params(key, num_classes):
    keys = iter(jax.random.split(key, 256))

    def conv(co, ci, kh, kw):
        std = (2.0 / (ci * kh * kw)) ** 0.5
        return jax.random.normal(next(keys), (co, ci, kh, kw), jnp.float32) * std

    def bn(c):
        k1, k2, k3, k4 = jax.random.split(next(keys), 4)
        gamma = jax.random.uniform(k1, (c,), jnp.float32, 0.5, 1.5)
        beta = jax.random.normal(k2, (c,), jnp.float32) * 0.1
        mean = jax.random.normal(k3, (c,), jnp.float32) * 0.1
        var = jax.random.uniform(k4, (c,), jnp.float32, 0.5, 1.5)
        scale = gamma * jax.lax.rsqrt(var + 1e-5)     # eval-mode BN fold
        shift = beta - mean * scale
        return scale, shift

    params = {'conv1_w': conv(64, 1, 7, 7), 'bn1': bn(64), 'layers': []}
    in_c = 64
    for planes, stride in [(64, 1), (128, 2), (256, 2), (512, 2)]:
        blocks = []
        for b in range(2):
            s = stride if b == 0 else 1
            blk = {'stride': s,
                   'conv1_w': conv(planes, in_c, 3, 3), 'bn1': bn(planes),
                   'conv2_w': conv(planes, planes, 3, 3), 'bn2': bn(planes)}
            if s != 1 or in_c != planes:
                blk['ds_conv_w'] = conv(planes, in_c, 1, 1)
                blk['ds_bn'] = bn(planes)
            blocks.append(blk)
            in_c = planes
        params['layers'].append(blocks)
    params['fc_w'] = jax.random.normal(next(keys), (num_classes, 512),
                                       jnp.float32) * (1.0 / 512 ** 0.5)
    return params


def _prep_conv_bn(w_oihw, bn):
    scale, shift = bn
    co, ci, kh, kw = w_oihw.shape
    k = kh * kw * ci
    wmat = jnp.transpose(w_oihw, (2, 3, 1, 0)).reshape(k, co)   # (kh,kw,ci) rows
    wmat = wmat * scale[None, :]                                # fold BN scale
    kp = _round_up(k, 16)                                       # bf16 sublane pack
    wmat = _pad_axis(wmat, kp, 0)
    return {'w': wmat.astype(jnp.bfloat16),
            'bias': shift.reshape(1, co).astype(jnp.float32),
            'kh': kh, 'kw': kw, 'ci': ci, 'k': k, 'kp': kp, 'co': co}


def prepare_params(raw):
    prep = {'conv1': _prep_conv_bn(raw['conv1_w'], raw['bn1']),
            'layers': [], 'fc_w': raw['fc_w']}
    for blocks in raw['layers']:
        pblocks = []
        for blk in blocks:
            pb = {'stride': blk['stride'],
                  'conv1': _prep_conv_bn(blk['conv1_w'], blk['bn1']),
                  'conv2': _prep_conv_bn(blk['conv2_w'], blk['bn2'])}
            if 'ds_conv_w' in blk:
                pb['ds'] = _prep_conv_bn(blk['ds_conv_w'], blk['ds_bn'])
            pblocks.append(pb)
        prep['layers'].append(pblocks)
    return prep


# ----------------------------------------------------------------------------
# Forward pass (matches FscilModel.forward semantics, eval-mode BN).
# ----------------------------------------------------------------------------
def encode(prep, x_nchw):
    x = jnp.transpose(x_nchw, (0, 2, 3, 1)).astype(jnp.bfloat16)  # NCHW -> NHWC
    y, shp = conv_bn(x, prep['conv1'], stride=2, pad=3, relu=True)
    y = y.reshape(shp)
    y = maxpool_3x3_s2_p1(y)
    for blocks in prep['layers']:
        for blk in blocks:
            y = basic_block(y, blk)
    # adaptive avg pool (1,1) + squeeze(-1).squeeze(-1), reduced in f32
    return jnp.mean(y.astype(jnp.float32), axis=(1, 2))            # (N, 512)


def fscil_forward(prep, x_nchw, mode='cos', temperature=16.0):
    feats = encode(prep, x_nchw)
    if mode == 'encoder':
        return feats
    if 'cos' in mode:
        return pallas_cos_head(feats, prep['fc_w'], temperature)
    elif 'dot' in mode:
        return pallas_dot_fc(feats, prep['fc_w'])
    raise ValueError('Unknown mode')


# ----------------------------------------------------------------------------
if __name__ == "__main__":
    key = jax.random.PRNGKey(0)
    k_param, k_x = jax.random.split(key)

    num_class = 60
    base_start_index = 0          # fc has (num_class - base_start_index) rows
    temperature = 16.0

    raw_params = init_params(k_param, num_class - base_start_index)
    params = prepare_params(raw_params)
    x = jax.random.normal(k_x, (2, 1, 32, 32), jnp.float32)   # NCHW, 1 input channel

    logits = fscil_forward(params, x, mode='cos', temperature=temperature)
    logits = jax.block_until_ready(logits)

    assert logits.shape == (2, num_class - base_start_index), logits.shape
    assert bool(jnp.all(jnp.isfinite(logits)))
    # cosine logits are bounded by temperature (small margin for bf16 rounding)
    assert bool(jnp.all(jnp.abs(logits) <= temperature + 1e-2))

    print("KERNEL_OK")
</pallas_src>

<mosaic_0001>
module attributes {stable_mosaic.version = 11 : i64} {
  func.func @_fused_gemm_kernel(%arg0: i32, %arg1: i32, %arg2: memref<128x64xbf16, #tpu.memory_space<vmem>>, %arg3: memref<64x64xbf16, #tpu.memory_space<vmem>>, %arg4: memref<1x64xf32, #tpu.memory_space<vmem>>, %arg5: memref<128x64xbf16, #tpu.memory_space<vmem>>) attributes {dimension_semantics = [#tpu.dimension_semantics<parallel>, #tpu.dimension_semantics<parallel>], iteration_bounds = array<i64: 4, 1>, scalar_prefetch = 0 : i64, scratch_operands = 0 : i64, tpu.core_type = #tpu.core_type<tc>, window_params = [{transform_indices = @transform_0, window_bounds = array<i64: 128, 64>}, {transform_indices = @transform_1, window_bounds = array<i64: 64, 64>}, {transform_indices = @transform_2, window_bounds = array<i64: 1, 64>}, {transform_indices = @transform_3, window_bounds = array<i64: 128, 64>}]} {
    %c0 = arith.constant 0 : index
    %c0_0 = arith.constant 0 : index
    %0 = vector.load %arg2[%c0, %c0_0] : memref<128x64xbf16, #tpu.memory_space<vmem>>, vector<128x64xbf16>
    %c0_1 = arith.constant 0 : index
    %c0_2 = arith.constant 0 : index
    %1 = vector.load %arg3[%c0_1, %c0_2] : memref<64x64xbf16, #tpu.memory_space<vmem>>, vector<64x64xbf16>
    %cst = arith.constant dense<0.000000e+00> : vector<128x64xf32>
    %2 = tpu.matmul %0, %1, %cst {dimension_numbers = #tpu.dot_dimension_numbers<[1], [0], [0], [1], [0, 0, 1, 1], [], []>} : vector<128x64xbf16>, vector<64x64xbf16>, vector<128x64xf32> -> vector<128x64xf32>
    %c0_3 = arith.constant 0 : index
    %c0_4 = arith.constant 0 : index
    %3 = vector.load %arg4[%c0_3, %c0_4] : memref<1x64xf32, #tpu.memory_space<vmem>>, vector<1x64xf32>
    %4 = vector.broadcast %3 : vector<1x64xf32> to vector<128x64xf32>
    %5 = arith.addf %2, %4 : vector<128x64xf32>
    %cst_5 = arith.constant 0.000000e+00 : f32
    %6 = vector.broadcast %cst_5 : f32 to vector<128x64xf32>
    %7 = arith.maximumf %5, %6 : vector<128x64xf32>
    %8 = arith.truncf %7 : vector<128x64xf32> to vector<128x64xbf16>
    %c0_6 = arith.constant 0 : index
    %c0_7 = arith.constant 0 : index
    %9 = vector.load %arg5[%c0_6, %c0_7] : memref<128x64xbf16, #tpu.memory_space<vmem>>, vector<128x64xbf16>
    tpu.vector_store %arg5[%c0_6, %c0_7], %8 {strides = array<i32>} : memref<128x64xbf16, #tpu.memory_space<vmem>>, vector<128x64xbf16>,
    return
  }
  func.func @transform_0(%arg0: i32, %arg1: i32) -> (i32, i32) {
    %c0_i32 = arith.constant 0 : i32
    %c0_i32_0 = arith.constant 0 : i32
    return %arg0, %c0_i32 : i32, i32
  }
  func.func @transform_1(%arg0: i32, %arg1: i32) -> (i32, i32) {
    %c0_i32 = arith.constant 0 : i32
    %c0_i32_0 = arith.constant 0 : i32
    return %c0_i32, %arg1 : i32, i32
  }
  func.func @transform_2(%arg0: i32, %arg1: i32) -> (i32, i32) {
    %c0_i32 = arith.constant 0 : i32
    %c0_i32_0 = arith.constant 0 : i32
    return %c0_i32, %arg1 : i32, i32
  }
  func.func @transform_3(%arg0: i32, %arg1: i32) -> (i32, i32) {
    %c0_i32 = arith.constant 0 : i32
    return %arg0, %arg1 : i32, i32
  }
}

</mosaic_0001>

<bundles_post_ra>
// kernel: tpu_custom_call.1
= control target key start
LH: loop header
LB: loop body
LE: loop exit
PB: predicated region body
PF: predicated region fallthrough
CT: control target
= control target key end

     0   :  { %s832_s12 = smov 0   ;;  %s834_s13 = smov 0   ;;  %s929_s0 = inlined_call_operand.vmem [shape: bf16[512,64], index: 0, kind: input, shape index: {}]   ;;  %s930_s1 = inlined_call_operand.vmem [shape: bf16[64,64], index: 1, kind: input, shape index: {}]   ;;  %s931_s2 = inlined_call_operand.vmem [shape: f32[1,64], index: 2, kind: input, shape index: {}]   ;;  %s932_s3 = inlined_call_operand.vmem [shape: bf16[512,64], index: 3, kind: output, shape index: {}]  }
   0x1   :  { %s836_s14 = smov 0  }
   0x2 LB: > { %s25_s15 = sadd.s32 1, %s806_s13  ;;  %p648_p0 = scmp.ge.s32.totalorder %s810_s14, 1  ;;  %s810_s14 = sphi %s836_s14, %s13_s14   ;;  %s806_s13 = sphi %s834_s13, %s934_s13   ;;  %s802_s12 = sphi %s832_s12, %s933_s12  }
   0x3   : > { %p27_p1 = scmp.ge.s32.totalorder %s25_s15, 4  ;;  %p169_p2 = scmp.lt.s32.totalorder %s810_s14, 5 }
   0x5   : > { %s936_s15 = smov (%p27_p1, %s25_s15), 0  ;;  %p170_p3 = pnand %p648_p0, %p169_p2 }
   0x6   : > { %v776_v0 = vld [vmem:[%s930_s1] sm:$0xff] (!%p170_p3)   ;;  %s649_s18 = sshll.u32 (!%p170_p3), %s802_s12, 4  ;;  %v777_v1 = vld [vmem:[%s930_s1 + $0x8] sm:$0xff] (!%p170_p3)   ;;  %v778_v2 = vld [vmem:[%s930_s1 + $0x10] sm:$0xff] (!%p170_p3)   ;;  %vm321_vm0 = vcmask (!%p170_p3), 523264   ;;  %vm523_vm1 = vcmask (!%p170_p3), 519168  }
   0x7   : > { %173 = sbr.rel (%p170_p3) target bundleno = 253 (0xfd), region = 32  ;;  %p204_p4 = scmp.lt.s32.totalorder (!%p170_p3), %s649_s18, 63  ;;  %720 = vmatprep.subr.bf16.mxu0 (!%p170_p3), %v776_v0  ;;  %744 = vmatprep.subr.bf16.mxu1 (!%p170_p3), %v776_v0  ;;  %v779_v3 = vld [vmem:[%s930_s1 + $0x18] sm:$0xff] (!%p170_p3)   ;;  %v653_v12 = vld [vmem:[%s931_s2] ss:$0 sm:$0xff] (!%p170_p3) }
   0x8   : > { %721 = vmatpush3.bf16.msra.mxu0 (!%p170_p3), %v776_v0  ;;  %748 = vmatpush3.bf16.msra.mxu1 (!%p170_p3), %v776_v0 }
   0x9   : > { %722 = vmatprep.subr.bf16.mxu0 (!%p170_p3), %v777_v1  ;;  %745 = vmatprep.subr.bf16.mxu1 (!%p170_p3), %v777_v1 }
   0xc   : > { %723 = vmatpush3.bf16.msra.mxu0 (!%p170_p3), %v777_v1  ;;  %749 = vmatpush3.bf16.msra.mxu1 (!%p170_p3), %v777_v1 }
   0xd   : > { %724 = vmatprep.subr.bf16.mxu0 (!%p170_p3), %v778_v2  ;;  %746 = vmatprep.subr.bf16.mxu1 (!%p170_p3), %v778_v2 }
   0xe   : > { %s938_s18 = smov (!%p204_p4, %s649_s18), 63 }
   0xf   : > { %s650_s23 = sshll.u32 %s938_s18, 2 }
  0x10   : > { %s207_s28 = scalar_lea.vmem %s929_s0, %s650_s23  ;;  %725 = vmatpush3.bf16.msra.mxu0 %v778_v2  ;;  %750 = vmatpush3.bf16.msra.mxu1 %v778_v2  ;;  %s886_s6 = scalar_lea.vmem %s932_s3, %s650_s23 }
  0x11   : > { %v780_v4 = vld [vmem:[%s207_s28] sm:$0xff]   ;;  %726 = vmatprep.subr.bf16.mxu0 %v779_v3  ;;  %747 = vmatprep.subr.bf16.mxu1 %v779_v3  ;;  %v782_v6 = vld [vmem:[%s207_s28 + $0x8] sm:$0xff]   ;;  %v784_v8 = vld [vmem:[%s207_s28 + $0x10] sm:$0xff]  }
  0x12   : > { %v781_v5 = vld [vmem:[%s207_s28 + $0x20] sm:$0xff]   ;;  %728 = vmatprep.mubr.msk.bf16.mxu0 %vm321_vm0, %v780_v4  ;;  %v783_v7 = vld [vmem:[%s207_s28 + $0x28] sm:$0xff]   ;;  %v785_v9 = vld [vmem:[%s207_s28 + $0x30] sm:$0xff]  }
  0x13   : > { %736 = vmatprep.mubr.msk.bf16.mxu1 %vm321_vm0, %v781_v5  ;;  %v786_v10 = vld [vmem:[%s207_s28 + $0x18] sm:$0xff]  }
  0x14   : > { %727 = vmatpush3.bf16.msra.mxu0 %v779_v3  ;;  %751 = vmatpush3.bf16.msra.mxu1 %v779_v3  ;;  %v787_v11 = vld [vmem:[%s207_s28 + $0x38] sm:$0xff]  }
  0x17   : > { %729 = vmatmul.mubr.msk.bf16.vlgmr.msra.gmra.mrb[0].mxu0 %vm321_vm0, %v782_v6  ;;  %737 = vmatmul.mubr.msk.bf16.vlgmr.msra.gmra.mrb[0].mxu1 %vm321_vm0, %v783_v7 }
  0x18   : > { %732 = vmatprep.mubr.msk.bf16.mxu0 %vm321_vm0, %v784_v8  ;;  %740 = vmatprep.mubr.msk.bf16.mxu1 %vm321_vm0, %v785_v9 }
  0x1f   : > { %733 = vmatmul.mubr.msk.bf16.gmra.mrb[4].mxu0 %vm321_vm0, %v786_v10  ;;  %741 = vmatmul.mubr.msk.bf16.gmra.mrb[4].mxu1 %vm321_vm0, %v787_v11 }
  0xea   : > { %v730_v13 = vpop.f32.mrb[0].mxu0  ;;  %v738_v14 = vpop.f32.mrb[0].mxu1 }
  0xeb   : > { %v389_v15 = vadd.f32 %v730_v13, %v653_v12  ;;  %v421_v16 = vadd.f32 %v738_v14, %v653_v12  ;;  %v380_v17 = vpop.f32.mrb[1].mxu0  ;;  %v412_v18 = vpop.f32.mrb[1].mxu1 }
  0xec   : > { %v381_v19 = vadd.f32 %v653_v12, %v380_v17  ;;  %v413_v20 = vadd.f32 %v653_v12, %v412_v18  ;;  %v731_v21 = vpop.f32.mrb[2].mxu0  ;;  %v739_v22 = vpop.f32.mrb[2].mxu1 }
  0xed   : > { %v445_v23 = vmax.f32 %v389_v15, 0.0  ;;  %v453_v24 = vmax.f32 %v421_v16, 0.0  ;;  %v392_v25 = vadd.f32 %v731_v21, %v653_v12  ;;  %v424_v26 = vadd.f32 %v739_v22, %v653_v12  ;;  %v383_v27 = vpop.f32.mrb[3].mxu0  ;;  %v415_v28 = vpop.f32.mrb[3].mxu1 }
  0xee   : > { %v443_v29 = vmax.f32 %v381_v19, 0.0  ;;  %v451_v30 = vmax.f32 %v413_v20, 0.0  ;;  %v384_v31 = vadd.f32 %v653_v12, %v383_v27  ;;  %v416_v32 = vadd.f32 %v653_v12, %v415_v28 }
  0xef   : > { %v694_v33 = vpack.c.bf16 %v445_v23, %v445_v23  ;;  %v702_v34 = vpack.c.bf16 %v453_v24, %v453_v24  ;;  %v446_v35 = vmax.f32 %v392_v25, 0.0  ;;  %v454_v36 = vmax.f32 %v424_v26, 0.0 }
  0xf0   : > { %v692_v37 = vpack.c.bf16 %v443_v29, %v443_v29  ;;  %v700_v38 = vpack.c.bf16 %v451_v30, %v451_v30  ;;  %v444_v39 = vmax.f32 %v384_v31, 0.0  ;;  %v452_v40 = vmax.f32 %v416_v32, 0.0 }
  0xf1   : > { %526 = vst.msk [vmem:[%s886_s6 + $0x8] sm:$0xf] %vm523_vm1, %v694_v33  ;;  %534 = vst.msk [vmem:[%s886_s6 + $0x28] sm:$0xf] %vm523_vm1, %v702_v34  ;;  %v695_v41 = vpack.c.bf16 %v446_v35, %v446_v35  ;;  %v703_v42 = vpack.c.bf16 %v454_v36, %v454_v36 }
  0xf2   : > { %524 = vst.msk [vmem:[%s886_s6] sm:$0xf] %vm523_vm1, %v692_v37  ;;  %532 = vst.msk [vmem:[%s886_s6 + $0x20] sm:$0xf] %vm523_vm1, %v700_v38  ;;  %v693_v43 = vpack.c.bf16 %v444_v39, %v444_v39  ;;  %v701_v44 = vpack.c.bf16 %v452_v40, %v452_v40  ;;  %v734_v45 = vpop.f32.mrb[4].mxu0  ;;  %v742_v46 = vpop.f32.mrb[4].mxu1 }
  0xf3   : > { %527 = vst.msk [vmem:[%s886_s6 + $0xc] sm:$0xf] %vm523_vm1, %v695_v41  ;;  %535 = vst.msk [vmem:[%s886_s6 + $0x2c] sm:$0xf] %vm523_vm1, %v703_v42  ;;  %v405_v47 = vadd.f32 %v734_v45, %v653_v12  ;;  %v437_v48 = vadd.f32 %v742_v46, %v653_v12  ;;  %v396_v49 = vpop.f32.mrb[5].mxu0  ;;  %v428_v50 = vpop.f32.mrb[5].mxu1 }
  0xf4   : > { %525 = vst.msk [vmem:[%s886_s6 + $0x4] sm:$0xf] %vm523_vm1, %v693_v43  ;;  %533 = vst.msk [vmem:[%s886_s6 + $0x24] sm:$0xf] %vm523_vm1, %v701_v44  ;;  %v397_v51 = vadd.f32 %v653_v12, %v396_v49  ;;  %v429_v52 = vadd.f32 %v653_v12, %v428_v50  ;;  %v735_v53 = vpop.f32.mrb[6].mxu0  ;;  %v743_v54 = vpop.f32.mrb[6].mxu1 }
  0xf5   : > { %v449_v55 = vmax.f32 %v405_v47, 0.0  ;;  %v457_v56 = vmax.f32 %v437_v48, 0.0  ;;  %v408_v57 = vadd.f32 %v735_v53, %v653_v12  ;;  %v440_v58 = vadd.f32 %v743_v54, %v653_v12  ;;  %v399_v59 = vpop.f32.mrb[7].mxu0  ;;  %v431_v60 = vpop.f32.mrb[7].mxu1 }
  0xf6   : > { %v447_v61 = vmax.f32 %v397_v51, 0.0  ;;  %v455_v62 = vmax.f32 %v429_v52, 0.0  ;;  %v400_v63 = vadd.f32 %v653_v12, %v399_v59  ;;  %v432_v0 = vadd.f32 %v653_v12, %v431_v60 }
  0xf7   : > { %v698_v1 = vpack.c.bf16 %v449_v55, %v449_v55  ;;  %v706_v2 = vpack.c.bf16 %v457_v56, %v457_v56  ;;  %v450_v3 = vmax.f32 %v408_v57, 0.0  ;;  %v458_v4 = vmax.f32 %v440_v58, 0.0 }
  0xf8   : > { %v696_v5 = vpack.c.bf16 %v447_v61, %v447_v61  ;;  %v704_v6 = vpack.c.bf16 %v455_v62, %v455_v62  ;;  %v448_v7 = vmax.f32 %v400_v63, 0.0  ;;  %v456_v8 = vmax.f32 %v432_v0, 0.0 }
  0xf9   : > { %530 = vst.msk [vmem:[%s886_s6 + $0x18] sm:$0xf] %vm523_vm1, %v698_v1  ;;  %538 = vst.msk [vmem:[%s886_s6 + $0x38] sm:$0xf] %vm523_vm1, %v706_v2  ;;  %v699_v9 = vpack.c.bf16 %v450_v3, %v450_v3  ;;  %v707_v10 = vpack.c.bf16 %v458_v4, %v458_v4 }
  0xfa   : > { %528 = vst.msk [vmem:[%s886_s6 + $0x10] sm:$0xf] %vm523_vm1, %v696_v5  ;;  %536 = vst.msk [vmem:[%s886_s6 + $0x30] sm:$0xf] %vm523_vm1, %v704_v6  ;;  %v697_v11 = vpack.c.bf16 %v448_v7, %v448_v7  ;;  %v705_v12 = vpack.c.bf16 %v456_v8, %v456_v8 }
  0xfb   : > { %531 = vst.msk [vmem:[%s886_s6 + $0x1c] sm:$0xf] %vm523_vm1, %v699_v9  ;;  %539 = vst.msk [vmem:[%s886_s6 + $0x3c] sm:$0xf] %vm523_vm1, %v707_v10 }
  0xfc   : > { %529 = vst.msk [vmem:[%s886_s6 + $0x14] sm:$0xf] %vm523_vm1, %v697_v11  ;;  %537 = vst.msk [vmem:[%s886_s6 + $0x34] sm:$0xf] %vm523_vm1, %v705_v12 }
  0xfd PF: > { %s13_s14 = sadd.s32 1, %s810_s14   ;;  %s933_s12 = smov %s806_s13 }
  0xfe   : > { %p10_p5 = scmp.ge.s32.totalorder %s13_s14, 6   ;;  %s934_s13 = smov %s936_s15 }
 0x100   :  { %12 = sbr.rel (!%p10_p5) target bundleno = 2 (0x2), region = 68 }

</bundles_post_ra>
